<compile_context>
chip_gen: v7x
topology: tpu7x:2x2x1
jax: 0.10.0
libtpu: 0.0.40
codegen_flags: <defaults>
</compile_context>

<pallas_src>
import functools

import jax
import jax.numpy as jnp
from jax.experimental import pallas as pl
from jax.experimental.pallas import tpu as pltpu


def _round_up(n: int, m: int) -> int:
    return ((n + m - 1) // m) * m


def _cdiv(a: int, b: int) -> int:
    return (a + b - 1) // b


def _tpu_generation() -> int:
    """Best-effort TPU generation (0 = unknown; safe f32/single-core defaults)."""
    try:
        kind = jax.devices()[0].device_kind.lower()
    except Exception:
        return 0
    for g in (7, 6, 5, 4):
        if f"v{g}" in kind:
            return g
    return 0


# ---------------------------------------------------------------------------
# Kernel
# ---------------------------------------------------------------------------
def dqn_kernel(x_ref, w1_ref, b1_ref, w2_ref, b2_ref, wh_ref, bh_ref, out_ref):
    # Cast the activation tile to bf16 in-kernel (no wrapper pad/cast HBM pass).
    x = x_ref[...].astype(jnp.bfloat16)                       # (tb, 33)

    # fc1: bf16 MXU matmul, f32 accumulate.  K=33 is zero-masked by Mosaic.
    h1 = jnp.dot(x, w1_ref[...], preferred_element_type=jnp.float32)
    # bias+ReLU epilogue in the bias dtype (bf16 on v6e/v7x, f32 on v5e).
    h1 = jnp.maximum(h1.astype(b1_ref.dtype) + b1_ref[...], 0.0).astype(jnp.bfloat16)

    # fc2
    h2 = jnp.dot(h1, w2_ref[...], preferred_element_type=jnp.float32)
    h2 = jnp.maximum(h2.astype(b2_ref.dtype) + b2_ref[...], 0.0).astype(jnp.bfloat16)

    # All 4 heads fused into one lane-dense (64 -> 128, cols 6..127 zero) matmul.
    out = jnp.dot(h2, wh_ref[...], preferred_element_type=jnp.float32)
    out_ref[...] = out + bh_ref[...]


# ---------------------------------------------------------------------------
# Wrapper
# ---------------------------------------------------------------------------
def dqn_forward(x, params, *, block_b: int = 2048, min_steps=None):
    """x: (B, input_dim) f32.  params from prepare_params(init_params(...)).

    Returns (direction_logits, tp_out, sl_out, lev_out), all f32.
    """
    w1, b1, w2, b2, wh, bh = params
    B, d_in = x.shape
    assert w1.shape[0] == d_in, (w1.shape, d_in)
    hidden = w1.shape[1]
    n_out = wh.shape[1]  # lane-padded fused head width (128); real outputs in cols 0:6

    gen = _tpu_generation()
    if min_steps is None:
        # v7x has 2 TensorCores: give the "parallel" batch axis an even, >=2-step grid.
        min_steps = 2 if gen >= 7 else 1

    # Balanced tiles, rounded to 16 rows; cdiv grid => no batch padding.
    steps = max(_cdiv(B, block_b), min_steps)
    if min_steps > 1 and steps % min_steps:
        steps = _round_up(steps, min_steps)
    tb = min(_round_up(_cdiv(B, steps), 16), _round_up(B, 16))
    grid = (_cdiv(B, tb),)

    const = lambda i: (0, 0)  # weights/biases stay VMEM-resident across the grid

    out = pl.pallas_call(
        dqn_kernel,
        out_shape=jax.ShapeDtypeStruct((B, n_out), jnp.float32),
        grid=grid,
        in_specs=[
            pl.BlockSpec((tb, d_in), lambda i: (i, 0)),    # x: batch-tiled, natural f32
            pl.BlockSpec((d_in, hidden), const),           # w1 (bf16)
            pl.BlockSpec((1, hidden), const),              # b1 (epilogue dtype)
            pl.BlockSpec((hidden, hidden), const),         # w2 (bf16)
            pl.BlockSpec((1, hidden), const),              # b2 (epilogue dtype)
            pl.BlockSpec((hidden, n_out), const),          # fused+padded head weight (bf16)
            pl.BlockSpec((1, n_out), const),               # fused+padded head bias (f32)
        ],
        out_specs=pl.BlockSpec((tb, n_out), lambda i: (i, 0)),
        compiler_params=pltpu.CompilerParams(
            dimension_semantics=("parallel",),
        ),
    )(x, w1, b1, w2, b2, wh, bh)

    # Slice the fused lane-dense head output back into the 4 PyTorch outputs.
    return out[:, 0:3], out[:, 3:4], out[:, 4:5], out[:, 5:6]


# ---------------------------------------------------------------------------
# Parameters (synthetic, PyTorch nn.Linear-style init)
# ---------------------------------------------------------------------------
def init_params(key, input_dim: int = 33, hidden_dim: int = 64):
    """Raw f32 params; weights stored pre-transposed as (in, out); the 4 heads are
    concatenated along the output axis into (hidden, 6)."""
    ks = jax.random.split(key, 12)

    def linear(kw, kb, fan_in, fan_out):
        bound = 1.0 / jnp.sqrt(jnp.float32(fan_in))
        w = jax.random.uniform(kw, (fan_in, fan_out), jnp.float32, -bound, bound)
        b = jax.random.uniform(kb, (1, fan_out), jnp.float32, -bound, bound)
        return w, b

    w1, b1 = linear(ks[0], ks[1], input_dim, hidden_dim)
    w2, b2 = linear(ks[2], ks[3], hidden_dim, hidden_dim)
    wd, bd = linear(ks[4], ks[5], hidden_dim, 3)     # direction_head
    wt, bt = linear(ks[6], ks[7], hidden_dim, 1)     # tp_head
    wsl, bsl = linear(ks[8], ks[9], hidden_dim, 1)   # sl_head
    wl, bl = linear(ks[10], ks[11], hidden_dim, 1)   # lev_head

    wh = jnp.concatenate([wd, wt, wsl, wl], axis=1)  # (hidden, 6)
    bh = jnp.concatenate([bd, bt, bsl, bl], axis=1)  # (1, 6)
    return (w1, b1, w2, b2, wh, bh)


def prepare_params(raw_params, *, head_pad: int = 128, epilogue_dtype=None):
    """Kernel-ready params: bf16 weights, fused heads lane-padded to `head_pad`
    columns (zeros), hidden-layer biases in the epilogue dtype (bf16 on v6e/v7x,
    f32 on v5e / unknown)."""
    if epilogue_dtype is None:
        epilogue_dtype = jnp.bfloat16 if _tpu_generation() >= 6 else jnp.float32
    w1, b1, w2, b2, wh, bh = raw_params
    n_out = wh.shape[1]
    whp = jnp.pad(wh, ((0, 0), (0, head_pad - n_out)))
    bhp = jnp.pad(bh, ((0, 0), (0, head_pad - n_out)))
    return (w1.astype(jnp.bfloat16), b1.astype(epilogue_dtype),
            w2.astype(jnp.bfloat16), b2.astype(epilogue_dtype),
            whp.astype(jnp.bfloat16), bhp.astype(jnp.float32))


# ---------------------------------------------------------------------------
# References
# ---------------------------------------------------------------------------
def dqn_reference_bf16(x, kernel_params):
    """Plain-JAX reference mirroring the kernel's dtype handling exactly."""
    w1, b1, w2, b2, wh, bh = kernel_params
    xb = x.astype(jnp.bfloat16)
    h1 = jnp.dot(xb, w1, preferred_element_type=jnp.float32)
    h1 = jnp.maximum(h1.astype(b1.dtype) + b1, 0.0).astype(jnp.bfloat16)
    h2 = jnp.dot(h1, w2, preferred_element_type=jnp.float32)
    h2 = jnp.maximum(h2.astype(b2.dtype) + b2, 0.0).astype(jnp.bfloat16)
    out = jnp.dot(h2, wh, preferred_element_type=jnp.float32) + bh
    return out[:, 0:3], out[:, 3:4], out[:, 4:5], out[:, 5:6]


def dqn_reference_f32(x, raw_params):
    """Full-precision reference matching the original PyTorch semantics."""
    w1, b1, w2, b2, wh, bh = raw_params
    h1 = jnp.maximum(x @ w1 + b1, 0.0)
    h2 = jnp.maximum(h1 @ w2 + b2, 0.0)
    out = h2 @ wh + bh
    return out[:, 0:3], out[:, 3:4], out[:, 4:5], out[:, 5:6]


# ---------------------------------------------------------------------------
# Main
# ---------------------------------------------------------------------------
if __name__ == "__main__":
    key = jax.random.PRNGKey(0)
    k_param, k_x = jax.random.split(key)

    input_dim, hidden_dim, batch = 33, 64, 200   # 200: exercises the ragged last tile
    raw_params = init_params(k_param, input_dim, hidden_dim)
    params = prepare_params(raw_params)
    x = jax.random.normal(k_x, (batch, input_dim), jnp.float32)

    # block_b=128 forces a >=2-step batch grid at batch=200 (partial last tile).
    fwd = jax.jit(functools.partial(dqn_forward, block_b=128))
    outs = jax.block_until_ready(fwd(x, params))

    names = ("direction_logits", "tp_out", "sl_out", "lev_out")
    expected_shapes = ((batch, 3), (batch, 1), (batch, 1), (batch, 1))

    # Tight check against a reference that mirrors the kernel's bf16 math.
    refs = dqn_reference_bf16(x, params)
    for name, shp, o, r in zip(names, expected_shapes, outs, refs):
        assert o.shape == shp, (name, o.shape, shp)
        assert jnp.allclose(o, r, atol=1e-2, rtol=1e-2), name

    # Loose sanity check against the full-precision PyTorch-semantics reference.
    refs32 = dqn_reference_f32(x, raw_params)
    for name, o, r in zip(names, outs, refs32):
        assert jnp.allclose(o, r, atol=5e-2, rtol=5e-2), name

    print("KERNEL_OK")
</pallas_src>

<mosaic_0001>
module attributes {stable_mosaic.version = 11 : i64} {
  func.func @dqn_kernel(%arg0: i32, %arg1: memref<112x33xf32, #tpu.memory_space<vmem>>, %arg2: memref<33x64xbf16, #tpu.memory_space<vmem>>, %arg3: memref<1x64xf32, #tpu.memory_space<vmem>>, %arg4: memref<64x64xbf16, #tpu.memory_space<vmem>>, %arg5: memref<1x64xf32, #tpu.memory_space<vmem>>, %arg6: memref<64x128xbf16, #tpu.memory_space<vmem>>, %arg7: memref<1x128xf32, #tpu.memory_space<vmem>>, %arg8: memref<112x128xf32, #tpu.memory_space<vmem>>) attributes {dimension_semantics = [#tpu.dimension_semantics<parallel>], iteration_bounds = array<i64: 2>, scalar_prefetch = 0 : i64, scratch_operands = 0 : i64, tpu.core_type = #tpu.core_type<tc>, window_params = [{transform_indices = @transform_0, window_bounds = array<i64: 112, 33>}, {pipeline_mode = #tpu.pipeline_mode<synchronous>, transform_indices = @transform_1, window_bounds = array<i64: 33, 64>}, {pipeline_mode = #tpu.pipeline_mode<synchronous>, transform_indices = @transform_2, window_bounds = array<i64: 1, 64>}, {pipeline_mode = #tpu.pipeline_mode<synchronous>, transform_indices = @transform_3, window_bounds = array<i64: 64, 64>}, {pipeline_mode = #tpu.pipeline_mode<synchronous>, transform_indices = @transform_4, window_bounds = array<i64: 1, 64>}, {pipeline_mode = #tpu.pipeline_mode<synchronous>, transform_indices = @transform_5, window_bounds = array<i64: 64, 128>}, {pipeline_mode = #tpu.pipeline_mode<synchronous>, transform_indices = @transform_6, window_bounds = array<i64: 1, 128>}, {transform_indices = @transform_7, window_bounds = array<i64: 112, 128>}]} {
    %c0 = arith.constant 0 : index
    %c0_0 = arith.constant 0 : index
    %0 = vector.load %arg1[%c0, %c0_0] : memref<112x33xf32, #tpu.memory_space<vmem>>, vector<112x33xf32>
    %1 = arith.truncf %0 : vector<112x33xf32> to vector<112x33xbf16>
    %c0_1 = arith.constant 0 : index
    %c0_2 = arith.constant 0 : index
    %2 = vector.load %arg2[%c0_1, %c0_2] : memref<33x64xbf16, #tpu.memory_space<vmem>>, vector<33x64xbf16>
    %cst = arith.constant dense<0.000000e+00> : vector<112x64xf32>
    %3 = tpu.matmul %1, %2, %cst {dimension_numbers = #tpu.dot_dimension_numbers<[1], [0], [0], [1], [0, 0, 1, 1], [], []>} : vector<112x33xbf16>, vector<33x64xbf16>, vector<112x64xf32> -> vector<112x64xf32>
    %c0_3 = arith.constant 0 : index
    %c0_4 = arith.constant 0 : index
    %4 = vector.load %arg3[%c0_3, %c0_4] : memref<1x64xf32, #tpu.memory_space<vmem>>, vector<1x64xf32>
    %5 = vector.broadcast %4 : vector<1x64xf32> to vector<112x64xf32>
    %6 = arith.addf %3, %5 : vector<112x64xf32>
    %cst_5 = arith.constant 0.000000e+00 : f32
    %7 = vector.broadcast %cst_5 : f32 to vector<112x64xf32>
    %8 = arith.maximumf %6, %7 : vector<112x64xf32>
    %9 = arith.truncf %8 : vector<112x64xf32> to vector<112x64xbf16>
    %c0_6 = arith.constant 0 : index
    %c0_7 = arith.constant 0 : index
    %10 = vector.load %arg4[%c0_6, %c0_7] : memref<64x64xbf16, #tpu.memory_space<vmem>>, vector<64x64xbf16>
    %cst_8 = arith.constant dense<0.000000e+00> : vector<112x64xf32>
    %11 = tpu.matmul %9, %10, %cst_8 {dimension_numbers = #tpu.dot_dimension_numbers<[1], [0], [0], [1], [0, 0, 1, 1], [], []>} : vector<112x64xbf16>, vector<64x64xbf16>, vector<112x64xf32> -> vector<112x64xf32>
    %c0_9 = arith.constant 0 : index
    %c0_10 = arith.constant 0 : index
    %12 = vector.load %arg5[%c0_9, %c0_10] : memref<1x64xf32, #tpu.memory_space<vmem>>, vector<1x64xf32>
    %13 = vector.broadcast %12 : vector<1x64xf32> to vector<112x64xf32>
    %14 = arith.addf %11, %13 : vector<112x64xf32>
    %cst_11 = arith.constant 0.000000e+00 : f32
    %15 = vector.broadcast %cst_11 : f32 to vector<112x64xf32>
    %16 = arith.maximumf %14, %15 : vector<112x64xf32>
    %17 = arith.truncf %16 : vector<112x64xf32> to vector<112x64xbf16>
    %c0_12 = arith.constant 0 : index
    %c0_13 = arith.constant 0 : index
    %18 = vector.load %arg6[%c0_12, %c0_13] : memref<64x128xbf16, #tpu.memory_space<vmem>>, vector<64x128xbf16>
    %cst_14 = arith.constant dense<0.000000e+00> : vector<112x128xf32>
    %19 = tpu.matmul %17, %18, %cst_14 {dimension_numbers = #tpu.dot_dimension_numbers<[1], [0], [0], [1], [0, 0, 1, 1], [], []>} : vector<112x64xbf16>, vector<64x128xbf16>, vector<112x128xf32> -> vector<112x128xf32>
    %c0_15 = arith.constant 0 : index
    %c0_16 = arith.constant 0 : index
    %20 = vector.load %arg7[%c0_15, %c0_16] : memref<1x128xf32, #tpu.memory_space<vmem>>, vector<1x128xf32>
    %21 = vector.broadcast %20 : vector<1x128xf32> to vector<112x128xf32>
    %22 = arith.addf %19, %21 : vector<112x128xf32>
    %c0_17 = arith.constant 0 : index
    %c0_18 = arith.constant 0 : index
    %23 = vector.load %arg8[%c0_17, %c0_18] : memref<112x128xf32, #tpu.memory_space<vmem>>, vector<112x128xf32>
    tpu.vector_store %arg8[%c0_17, %c0_18], %22 {strides = array<i32>} : memref<112x128xf32, #tpu.memory_space<vmem>>, vector<112x128xf32>,
    return
  }
  func.func @transform_0(%arg0: i32) -> (i32, i32) {
    %c0_i32 = arith.constant 0 : i32
    %c0_i32_0 = arith.constant 0 : i32
    return %arg0, %c0_i32 : i32, i32
  }
  func.func @transform_1(%arg0: i32) -> (i32, i32) {
    %c0_i32 = arith.constant 0 : i32
    %c0_i32_0 = arith.constant 0 : i32
    %c0_i32_1 = arith.constant 0 : i32
    return %c0_i32, %c0_i32_0 : i32, i32
  }
  func.func @transform_2(%arg0: i32) -> (i32, i32) {
    %c0_i32 = arith.constant 0 : i32
    %c0_i32_0 = arith.constant 0 : i32
    %c0_i32_1 = arith.constant 0 : i32
    return %c0_i32, %c0_i32_0 : i32, i32
  }
  func.func @transform_3(%arg0: i32) -> (i32, i32) {
    %c0_i32 = arith.constant 0 : i32
    %c0_i32_0 = arith.constant 0 : i32
    %c0_i32_1 = arith.constant 0 : i32
    return %c0_i32, %c0_i32_0 : i32, i32
  }
  func.func @transform_4(%arg0: i32) -> (i32, i32) {
    %c0_i32 = arith.constant 0 : i32
    %c0_i32_0 = arith.constant 0 : i32
    %c0_i32_1 = arith.constant 0 : i32
    return %c0_i32, %c0_i32_0 : i32, i32
  }
  func.func @transform_5(%arg0: i32) -> (i32, i32) {
    %c0_i32 = arith.constant 0 : i32
    %c0_i32_0 = arith.constant 0 : i32
    %c0_i32_1 = arith.constant 0 : i32
    return %c0_i32, %c0_i32_0 : i32, i32
  }
  func.func @transform_6(%arg0: i32) -> (i32, i32) {
    %c0_i32 = arith.constant 0 : i32
    %c0_i32_0 = arith.constant 0 : i32
    %c0_i32_1 = arith.constant 0 : i32
    return %c0_i32, %c0_i32_0 : i32, i32
  }
  func.func @transform_7(%arg0: i32) -> (i32, i32) {
    %c0_i32 = arith.constant 0 : i32
    %c0_i32_0 = arith.constant 0 : i32
    return %arg0, %c0_i32 : i32, i32
  }
}

</mosaic_0001>

<bundles_post_ra>
// kernel: dqn_forward.1
= control target key start
LH: loop header
LB: loop body
LE: loop exit
PB: predicated region body
PF: predicated region fallthrough
CT: control target
= control target key end

     0   :  { %s1526_s24 = smov 0   ;;  %s1528_s25 = smov 0   ;;  %s1838_s0 = inlined_call_operand.vmem [shape: f32[200,33], index: 0, kind: input, shape index: {}]   ;;  %s1839_s1 = inlined_call_operand.vmem [shape: bf16[33,64], index: 1, kind: input, shape index: {}]   ;;  %s1840_s2 = inlined_call_operand.vmem [shape: f32[1,64], index: 2, kind: input, shape index: {}]   ;;  %s1841_s3 = inlined_call_operand.vmem [shape: bf16[64,64], index: 3, kind: input, shape index: {}]   ;;  %s1842_s4 = inlined_call_operand.vmem [shape: f32[1,64], index: 4, kind: input, shape index: {}]   ;;  %s1843_s5 = inlined_call_operand.vmem [shape: bf16[64,128], index: 5, kind: input, shape index: {}]   ;;  %s1844_s6 = inlined_call_operand.vmem [shape: f32[1,128], index: 6, kind: input, shape index: {}]   ;;  %s1845_s7 = inlined_call_operand.vmem [shape: f32[200,128], index: 7, kind: output, shape index: {}]  }
   0x1   :  { %s1530_s26 = smov 0  }
   0x2 LB: > { %s1539_s27 = sadd.s32 4294967295, %s1449_s26   ;;  %s1541_s28 = sadd.s32 1, %s1449_s26   ;;  %s1449_s26 = sphi %s1530_s26, %s1852_s26   ;;  %s1445_s25 = sphi %s1528_s25, %s1851_s25   ;;  %s1441_s24 = sphi %s1526_s24, %s1850_s24  }
   0x3   : > { %s173_s29 = ssub.s32 %s1449_s26, %s1541_s28  ;;  %s176_s30 = sadd.s32 1, %s1445_s25 }
   0x4   : > { %p174_p0 = scmp.eq.s32.totalorder %s173_s29, 0  ;;  %p186_p1 = scmp.ne.s32.totalorder %s1445_s25, %s1441_s24 }
   0x5   : > { %p187_p2 = scmp.eq.s32.totalorder %s1539_s27, 1  ;;  %p1093_p3 = scmp.ge.s32.totalorder %s1449_s26, 1 }
   0x6   : > { %s1549_s8 = scalar_select %p174_p0, %s1445_s25, %s176_s30  }
   0x7   : > { %p1551_p4 = por %p187_p2, %p186_p1  ;;  %p246_p5 = scmp.lt.s32.totalorder %s1449_s26, 3 }
   0x9   : > { %p247_p6 = pnand %p1093_p3, %p246_p5 }
   0xa   : > { %v1380_v0 = vld [vmem:[%s1839_s1] sm:$0xff] (!%p247_p6)   ;;  %v1483_v1 = vmov (!%p247_p6), 0.0   ;;  %v1381_v2 = vld [vmem:[%s1839_s1 + $0x8] sm:$0xff] (!%p247_p6)   ;;  %vm371_vm0 = vcmask (!%p247_p6), 1040384   ;;  %v1484_v4 = vmov (!%p247_p6), 0   ;;  %s1568_s16 = smul.u32 (!%p247_p6), 14, %s1539_s27 }
   0xb   : > { %250 = sbr.rel (%p247_p6) target bundleno = 791 (0x317), region = 48  ;;  %1175 = vmatprep.subr.bf16.mxu0 (!%p247_p6), %v1483_v1  ;;  %1281 = vmatprep.subr.bf16.mxu1 (!%p247_p6), %v1483_v1  ;;  %v1382_v3 = vld [vmem:[%s1839_s1 + $0x10] ss:$0 sps:$4 sm:$0x11] (!%p247_p6)   ;;  %v373_v5 = vsel (!%p247_p6), %vm371_vm0, 65535, %v1484_v4  ;;  %vm1485_vm1 = vmmov (!%p247_p6), 0  }
   0xc   : > { %1176 = vmatpush3.bf16.msra.mxu0 (!%p247_p6), %v1380_v0  ;;  %1284 = vmatpush3.bf16.msra.mxu1 (!%p247_p6), %v1380_v0  ;;  %p286_p7 = scmp.lt.s32.totalorder (!%p247_p6), %s1568_s16, 24  ;;  %v375_v6 = vand.u32 (!%p247_p6), %v1382_v3, %v373_v5  ;;  %vm349_vm2 = vcmask (!%p247_p6), 269312   ;;  %v1383_v12 = vld [vmem:[%s1841_s3] sm:$0xff] (!%p247_p6)   ;;  %v1384_v19 = vld [vmem:[%s1841_s3 + $0x8] sm:$0xff] (!%p247_p6)   ;;  %v1385_v21 = vld [vmem:[%s1841_s3 + $0x10] sm:$0xff] (!%p247_p6)   ;;  %vm526_vm3 = vcmask (!%p247_p6), 523264  }
   0xd   : > { %1177 = vmatprep.subr.bf16.mxu0 (!%p247_p6), %v1483_v1  ;;  %1282 = vmatprep.subr.bf16.mxu1 (!%p247_p6), %v1483_v1  ;;  %v1386_v31 = vld [vmem:[%s1841_s3 + $0x18] sm:$0xff] (!%p247_p6)   ;;  %v1387_v32 = vld [vmem:[%s1843_s5] sm:$0xff] (!%p247_p6)   ;;  %v1388_v33 = vld [vmem:[%s1843_s5 + $0x8] sm:$0xff] (!%p247_p6)   ;;  %s278_s30 = sand.u32 (!%p247_p6), 1, %s1441_s24  }
   0xe   : > { %1181 = vmatprep.mubr.msk.bf16.mxu0 (!%p247_p6), %vm1485_vm1, %v1483_v1  ;;  %1197 = vmatprep.mubr.msk.bf16.mxu1 (!%p247_p6), %vm1485_vm1, %v1483_v1  ;;  %v1389_v34 = vld [vmem:[%s1843_s5 + $0x10] sm:$0xff] (!%p247_p6)   ;;  %v1651_v35 = vld [vmem:[%s1840_s2] ss:$0 sm:$0xff] (!%p247_p6)  ;;  %s1287_s10 = smul.u32 (!%p247_p6), 112, %s278_s30 }
  0x10   : > { %1178 = vmatpush3.bf16.msra.mxu0 (!%p247_p6), %v1381_v2  ;;  %1285 = vmatpush3.bf16.msra.mxu1 (!%p247_p6), %v1381_v2  ;;  %s1731_s13 = scalar_lea.vmem (!%p247_p6), [#allocation2], %s1287_s10  }
  0x11   : > { %1179 = vmatprep.subr.bf16.mxu0 (!%p247_p6), %v1483_v1  ;;  %1283 = vmatprep.subr.bf16.mxu1 (!%p247_p6), %v1483_v1 }
  0x12   : > { %s287_s17 = scalar_select %p286_p7, %s1568_s16, 24 }
  0x13   : > { %s829_s24 = ssub.s32 (%p1551_p4), 25, %s1568_s16  ;;  %s1142_s14 = smul.u32 (%p1551_p4), 112, %s1539_s27 }
  0x14   : > { %s1094_s18 = sshll.u32 %s287_s17, 3  ;;  %1180 = vmatpush3.bf16.msra.mxu0 %v375_v6  ;;  %1286 = vmatpush3.bf16.msra.mxu1 %v375_v6  ;;  %p830_p8 = scmp.lt.s32.totalorder (%p1551_p4), %s829_s24, 14 }
  0x15   : > { %s1582_s21 = scalar_lea.vmem %s1838_s0, %s1094_s18  ;;  %1209 = vmatprep.subr.bf16.mxu1 %v1483_v1  ;;  %1245 = vmatprep.subr.bf16.mxu0 %v1483_v1  ;;  %s1754_s18 = scalar_lea.vmem (%p1551_p4), %s1845_s7, %s1142_s14  }
  0x16   : > { %v301_v7 = vld [vmem:[%s1582_s21] sm:$0xff]  ;;  %v302_v8 = vld [vmem:[%s1582_s21 + $0x8] sm:$0xff]  ;;  %v303_v13 = vld [vmem:[%s1582_s21 + $0x10] sm:$0xff] }
  0x17   : > { %v315_v9 = vpack.c.bf16 %v302_v8, %v301_v7  ;;  %v309_v10 = vld [vmem:[%s1582_s21 + $0x40] sm:$0xff]  ;;  %v310_v11 = vld [vmem:[%s1582_s21 + $0x48] sm:$0xff]  ;;  %v304_v14 = vld [vmem:[%s1582_s21 + $0x18] sm:$0xff] }
  0x18   : > { %v319_v15 = vpack.c.bf16 %v310_v11, %v309_v10  ;;  %v316_v16 = vpack.c.bf16 %v304_v14, %v303_v13  ;;  %v311_v17 = vld [vmem:[%s1582_s21 + $0x50] sm:$0xff]  ;;  %v312_v18 = vld [vmem:[%s1582_s21 + $0x58] sm:$0xff]  ;;  %v305_v22 = vld [vmem:[%s1582_s21 + $0x20] sm:$0xff] }
  0x19   : > { %1182 = vmatmul.mubr.msk.bf16.vlgmr.msra.gmra.mrb[0].mxu0 %vm349_vm2, %v315_v9  ;;  %v320_v20 = vpack.c.bf16 %v312_v18, %v311_v17  ;;  %v306_v23 = vld [vmem:[%s1582_s21 + $0x28] sm:$0xff]  ;;  %v313_v25 = vld [vmem:[%s1582_s21 + $0x60] sm:$0xff]  ;;  %v307_v28 = vld [vmem:[%s1582_s21 + $0x30] sm:$0xff] }
  0x1a   : > { %1185 = vmatprep.mubr.msk.bf16.mxu0 %vm1485_vm1, %v1483_v1  ;;  %1198 = vmatmul.mubr.msk.bf16.vlgmr.msra.gmra.mrb[0].mxu1 %vm349_vm2, %v319_v15  ;;  %v317_v24 = vpack.c.bf16 %v306_v23, %v305_v22  ;;  %v314_v26 = vld [vmem:[%s1582_s21 + $0x68] sm:$0xff]  ;;  %v308_v29 = vld [vmem:[%s1582_s21 + $0x38] sm:$0xff] }
  0x1b   : > { %1201 = vmatprep.mubr.msk.bf16.mxu1 %vm1485_vm1, %v1483_v1  ;;  %1210 = vmatpush3.bf16.msra.mxu1 %v1383_v12  ;;  %v321_v27 = vpack.c.bf16 %v314_v26, %v313_v25  ;;  %v318_v30 = vpack.c.bf16 %v308_v29, %v307_v28 }
  0x1c   : > { %1211 = vmatprep.subr.bf16.mxu1 %v1483_v1  ;;  %1246 = vmatpush3.bf16.msra.mxu0 %v1387_v32 }
  0x1d   : > { %1247 = vmatprep.subr.bf16.mxu0 %v1483_v1 }
  0x1f   : > { %1212 = vmatpush3.bf16.msra.mxu1 %v1384_v19 }
  0x20   : > { %1213 = vmatprep.subr.bf16.mxu1 %v1483_v1  ;;  %1248 = vmatpush3.bf16.msra.mxu0 %v1388_v33 }
  0x21   : > { %1186 = vmatmul.mubr.msk.bf16.gmra.mrb[4].mxu0 %vm349_vm2, %v316_v16  ;;  %1249 = vmatprep.subr.bf16.mxu0 %v1483_v1 }
  0x22   : > { %1189 = vmatprep.mubr.msk.bf16.mxu0 %vm1485_vm1, %v1483_v1  ;;  %1202 = vmatmul.mubr.msk.bf16.gmra.mrb[4].mxu1 %vm349_vm2, %v320_v20 }
  0x23   : > { %1205 = vmatprep.mubr.msk.bf16.mxu1 %vm1485_vm1, %v1483_v1  ;;  %1214 = vmatpush3.bf16.msra.mxu1 %v1385_v21 }
  0x24   : > { %1215 = vmatprep.subr.bf16.mxu1 %v1483_v1  ;;  %1250 = vmatpush3.bf16.msra.mxu0 %v1389_v34 }
  0x25   : > { %1251 = vmatprep.subr.bf16.mxu0 %v1483_v1 }
  0x27   : > { %1216 = vmatpush3.bf16.msra.mxu1 %v1386_v31 }
  0x29   : > { %1190 = vmatmul.mubr.msk.bf16.gmra.mrb[8].mxu0 %vm349_vm2, %v317_v24 }
  0x2a   : > { %1193 = vmatprep.mubr.msk.bf16.mxu0 %vm1485_vm1, %v1483_v1  ;;  %1206 = vmatmul.mubr.msk.bf16.gmra.mrb[8].mxu1 %vm349_vm2, %v321_v27 }
  0x2b   : > { %1217 = vmatprep.mubr.msk.bf16.mxu1 %vm1485_vm1, %v1483_v1 }
  0x31   : > { %1194 = vmatmul.mubr.msk.bf16.gmra.mrb[12].mxu0 %vm349_vm2, %v318_v30 }
  0x32   : > { %1253 = vmatprep.mubr.msk.bf16.mxu0 %vm1485_vm1, %v1483_v1 }
  0xec   : > { %v411_v36 = vpop.f32.mrb[0].mxu0 }
  0xed   : > { %v412_v37 = vadd.f32 %v1651_v35, %v411_v36  ;;  %v1183_v38 = vpop.f32.mrb[1].mxu0  ;;  %v443_v42 = vpop.f32.mrb[0].mxu1 }
  0xee   : > { %v414_v39 = vpop.f32.mrb[2].mxu0  ;;  %v444_v43 = vadd.f32 %v1651_v35, %v443_v42  ;;  %v1199_v44 = vpop.f32.mrb[1].mxu1 }
  0xef   : > { %v415_v40 = vadd.f32 %v1651_v35, %v414_v39  ;;  %v1184_v41 = vpop.f32.mrb[3].mxu0  ;;  %v466_v45 = vmax.f32 %v412_v37, 0.0  ;;  %v446_v47 = vpop.f32.mrb[2].mxu1  ;;  %v1692_v37 = vld [vmem:[%s1842_s4] ss:$0 sm:$0xff] }
  0xf0   : > { %v474_v48 = vmax.f32 %v444_v43, 0.0  ;;  %v447_v49 = vadd.f32 %v1651_v35, %v446_v47  ;;  %v1200_v50 = vpop.f32.mrb[3].mxu1 }
  0xf1   : > { %v467_v46 = vmax.f32 %v415_v40, 0.0 }
  0xf2   : > { %v475_v53 = vmax.f32 %v447_v49, 0.0 }
  0xf3   : > { %v480_v51 = vpack.c.bf16 %v467_v46, %v466_v45 }
  0xf4   : > { %v419_v52 = vpop.f32.mrb[4].mxu0  ;;  %v484_v57 = vpack.c.bf16 %v475_v53, %v474_v48 }
  0xf5   : > { %v420_v54 = vadd.f32 %v1651_v35, %v419_v52  ;;  %v1187_v55 = vpop.f32.mrb[5].mxu0  ;;  %1218 = vmatmul.mubr.msk.bf16.vlgmr.msra.gmra.mrb[12].mxu1 %vm526_vm3, %v480_v51  ;;  %v451_v60 = vpop.f32.mrb[4].mxu1 }
  0xf6   : > { %v422_v56 = vpop.f32.mrb[6].mxu0  ;;  %1221 = vmatprep.mubr.msk.bf16.mxu1 %vm1485_vm1, %v1483_v1  ;;  %v452_v61 = vadd.f32 %v1651_v35, %v451_v60  ;;  %v1203_v62 = vpop.f32.mrb[5].mxu1 }
  0xf7   : > { %v423_v58 = vadd.f32 %v1651_v35, %v422_v56  ;;  %v1188_v59 = vpop.f32.mrb[7].mxu0  ;;  %v468_v63 = vmax.f32 %v420_v54, 0.0  ;;  %v454_v2 = vpop.f32.mrb[6].mxu1 }
  0xf8   : > { %v476_v3 = vmax.f32 %v452_v61, 0.0  ;;  %v455_v4 = vadd.f32 %v1651_v35, %v454_v2  ;;  %v1204_v5 = vpop.f32.mrb[7].mxu1 }
  0xf9   : > { %v469_v0 = vmax.f32 %v423_v58, 0.0 }
  0xfa   : > { %v477_v8 = vmax.f32 %v455_v4, 0.0 }
  0xfb   : > { %v481_v6 = vpack.c.bf16 %v469_v0, %v468_v63 }
  0xfc   : > { %v427_v7 = vpop.f32.mrb[8].mxu0  ;;  %v485_v12 = vpack.c.bf16 %v477_v8, %v476_v3 }
  0xfd   : > { %v428_v9 = vadd.f32 %v1651_v35, %v427_v7  ;;  %v1191_v10 = vpop.f32.mrb[9].mxu0  ;;  %1222 = vmatmul.mubr.msk.bf16.gmra.mrb[16].mxu1 %vm526_vm3, %v481_v6  ;;  %v459_v15 = vpop.f32.mrb[8].mxu1 }
  0xfe   : > { %v430_v11 = vpop.f32.mrb[10].mxu0  ;;  %1225 = vmatprep.mubr.msk.bf16.mxu1 %vm1485_vm1, %v1483_v1  ;;  %v460_v16 = vadd.f32 %v1651_v35, %v459_v15  ;;  %v1207_v17 = vpop.f32.mrb[9].mxu1 }
  0xff   : > { %v431_v13 = vadd.f32 %v1651_v35, %v430_v11  ;;  %v1192_v14 = vpop.f32.mrb[11].mxu0  ;;  %v470_v18 = vmax.f32 %v428_v9, 0.0  ;;  %v462_v20 = vpop.f32.mrb[10].mxu1 }
 0x100   : > { %v478_v21 = vmax.f32 %v460_v16, 0.0  ;;  %v463_v22 = vadd.f32 %v1651_v35, %v462_v20  ;;  %v1208_v23 = vpop.f32.mrb[11].mxu1 }
 0x101   : > { %v471_v19 = vmax.f32 %v431_v13, 0.0 }
 0x102   : > { %v479_v26 = vmax.f32 %v463_v22, 0.0 }
 0x103   : > { %v482_v24 = vpack.c.bf16 %v471_v19, %v470_v18 }
 0x104   : > { %v435_v25 = vpop.f32.mrb[12].mxu0  ;;  %v486_v30 = vpack.c.bf16 %v479_v26, %v478_v21 }
 0x105   : > { %v436_v27 = vadd.f32 %v1651_v35, %v435_v25  ;;  %v1195_v28 = vpop.f32.mrb[13].mxu0  ;;  %1226 = vmatmul.mubr.msk.bf16.gmra.mrb[20].mxu1 %vm526_vm3, %v482_v24 }
 0x106   : > { %v438_v29 = vpop.f32.mrb[14].mxu0  ;;  %1229 = vmatprep.mubr.msk.bf16.mxu1 %vm1485_vm1, %v1483_v1 }
 0x107   : > { %v439_v31 = vadd.f32 %v1651_v35, %v438_v29  ;;  %v1196_v32 = vpop.f32.mrb[15].mxu0  ;;  %v472_v33 = vmax.f32 %v436_v27, 0.0  ;;  %v1390_v35 = vld [vmem:[%s1843_s5 + $0x18] sm:$0xff]  }
 0x108   : > { %1252 = vmatpush3.bf16.msra.mxu0 %v1390_v35 }
 0x109   : > { %v473_v34 = vmax.f32 %v439_v31, 0.0 }
 0x10b   : > { %v483_v36 = vpack.c.bf16 %v473_v34, %v472_v33 }
 0x10d   : > { %1230 = vmatmul.mubr.msk.bf16.gmra.mrb[24].mxu1 %vm526_vm3, %v483_v36 }
 0x10e   : > { %1233 = vmatprep.mubr.msk.bf16.mxu1 %vm1485_vm1, %v1483_v1 }
 0x115   : > { %1234 = vmatmul.mubr.msk.bf16.gmra.mrb[28].mxu1 %vm526_vm3, %v484_v57 }
 0x116   : > { %1237 = vmatprep.mubr.msk.bf16.mxu1 %vm1485_vm1, %v1483_v1 }
 0x11d   : > { %1238 = vmatmul.mubr.msk.bf16.gmra.mrb[32].mxu1 %vm526_vm3, %v485_v12 }
 0x11e   : > { %1241 = vmatprep.mubr.msk.bf16.mxu1 %vm1485_vm1, %v1483_v1 }
 0x125   : > { %1242 = vmatmul.mubr.msk.bf16.gmra.mrb[36].mxu1 %vm526_vm3, %v486_v30 }
 0x1c8   : > { %v582_v38 = vpop.f32.mrb[12].mxu1 }
 0x1c9   : > { %v583_v39 = vadd.f32 %v1692_v37, %v582_v38  ;;  %v1219_v40 = vpop.f32.mrb[13].mxu1 }
 0x1ca   : > { %v585_v41 = vpop.f32.mrb[14].mxu1 }
 0x1cb   : > { %v586_v42 = vadd.f32 %v1692_v37, %v585_v41  ;;  %v1220_v43 = vpop.f32.mrb[15].mxu1  ;;  %v637_v44 = vmax.f32 %v583_v39, 0.0  ;;  %v1118_v39 = vld [vmem:[%s1844_s6] ss:$0 sm:$0xff] }
 0x1cd   : > { %v638_v45 = vmax.f32 %v586_v42, 0.0 }
 0x1cf   : > { %v651_v46 = vpack.c.bf16 %v638_v45, %v637_v44 }
 0x1d0   : > { %v590_v47 = vpop.f32.mrb[16].mxu1 }
 0x1d1   : > { %v591_v48 = vadd.f32 %v1692_v37, %v590_v47  ;;  %v1223_v49 = vpop.f32.mrb[17].mxu1  ;;  %1254 = vmatmul.mubr.msk.bf16.vlgmr.msra.gmra.mrb[16].mxu0 %vm526_vm3, %v651_v46 }
 0x1d2   : > { %v593_v50 = vpop.f32.mrb[18].mxu1  ;;  %1257 = vmatprep.mubr.msk.bf16.mxu0 %vm1485_vm1, %v1483_v1 }
 0x1d3   : > { %v594_v51 = vadd.f32 %v1692_v37, %v593_v50  ;;  %v1224_v52 = vpop.f32.mrb[19].mxu1  ;;  %v639_v53 = vmax.f32 %v591_v48, 0.0 }
 0x1d5   : > { %v640_v54 = vmax.f32 %v594_v51, 0.0 }
 0x1d7   : > { %v652_v55 = vpack.c.bf16 %v640_v54, %v639_v53 }
 0x1d8   : > { %v598_v56 = vpop.f32.mrb[20].mxu1 }
 0x1d9   : > { %v599_v57 = vadd.f32 %v1692_v37, %v598_v56  ;;  %v1227_v58 = vpop.f32.mrb[21].mxu1  ;;  %1258 = vmatmul.mubr.msk.bf16.gmra.mrb[20].mxu0 %vm526_vm3, %v652_v55 }
 0x1da   : > { %v601_v59 = vpop.f32.mrb[22].mxu1  ;;  %1261 = vmatprep.mubr.msk.bf16.mxu0 %vm1485_vm1, %v1483_v1 }
 0x1db   : > { %v602_v60 = vadd.f32 %v1692_v37, %v601_v59  ;;  %v1228_v61 = vpop.f32.mrb[23].mxu1  ;;  %v641_v62 = vmax.f32 %v599_v57, 0.0 }
 0x1dd   : > { %v642_v63 = vmax.f32 %v602_v60, 0.0 }
 0x1df   : > { %v653_v0 = vpack.c.bf16 %v642_v63, %v641_v62 }
 0x1e0   : > { %v606_v2 = vpop.f32.mrb[24].mxu1 }
 0x1e1   : > { %v607_v3 = vadd.f32 %v1692_v37, %v606_v2  ;;  %v1231_v4 = vpop.f32.mrb[25].mxu1  ;;  %1262 = vmatmul.mubr.msk.bf16.gmra.mrb[24].mxu0 %vm526_vm3, %v653_v0 }
 0x1e2   : > { %v609_v5 = vpop.f32.mrb[26].mxu1  ;;  %1265 = vmatprep.mubr.msk.bf16.mxu0 %vm1485_vm1, %v1483_v1 }
 0x1e3   : > { %v610_v6 = vadd.f32 %v1692_v37, %v609_v5  ;;  %v1232_v7 = vpop.f32.mrb[27].mxu1  ;;  %v643_v8 = vmax.f32 %v607_v3, 0.0 }
 0x1e5   : > { %v644_v9 = vmax.f32 %v610_v6, 0.0 }
 0x1e7   : > { %v654_v10 = vpack.c.bf16 %v644_v9, %v643_v8 }
 0x1e8   : > { %v614_v11 = vpop.f32.mrb[28].mxu1 }
 0x1e9   : > { %v615_v12 = vadd.f32 %v1692_v37, %v614_v11  ;;  %v1235_v13 = vpop.f32.mrb[29].mxu1  ;;  %1266 = vmatmul.mubr.msk.bf16.gmra.mrb[28].mxu0 %vm526_vm3, %v654_v10 }
 0x1ea   : > { %v617_v14 = vpop.f32.mrb[30].mxu1  ;;  %1269 = vmatprep.mubr.msk.bf16.mxu0 %vm1485_vm1, %v1483_v1 }
 0x1eb   : > { %v618_v15 = vadd.f32 %v1692_v37, %v617_v14  ;;  %v1236_v16 = vpop.f32.mrb[31].mxu1  ;;  %v645_v17 = vmax.f32 %v615_v12, 0.0 }
 0x1ed   : > { %v646_v18 = vmax.f32 %v618_v15, 0.0 }
 0x1ef   : > { %v655_v19 = vpack.c.bf16 %v646_v18, %v645_v17 }
 0x1f0   : > { %v622_v20 = vpop.f32.mrb[32].mxu1 }
 0x1f1   : > { %v623_v21 = vadd.f32 %v1692_v37, %v622_v20  ;;  %v1239_v22 = vpop.f32.mrb[33].mxu1  ;;  %1270 = vmatmul.mubr.msk.bf16.gmra.mrb[32].mxu0 %vm526_vm3, %v655_v19 }
 0x1f2   : > { %v625_v23 = vpop.f32.mrb[34].mxu1  ;;  %1273 = vmatprep.mubr.msk.bf16.mxu0 %vm1485_vm1, %v1483_v1 }
 0x1f3   : > { %v626_v24 = vadd.f32 %v1692_v37, %v625_v23  ;;  %v1240_v25 = vpop.f32.mrb[35].mxu1  ;;  %v647_v26 = vmax.f32 %v623_v21, 0.0 }
 0x1f5   : > { %v648_v27 = vmax.f32 %v626_v24, 0.0 }
 0x1f7   : > { %v656_v28 = vpack.c.bf16 %v648_v27, %v647_v26 }
 0x1f8   : > { %v630_v29 = vpop.f32.mrb[36].mxu1 }
 0x1f9   : > { %v631_v30 = vadd.f32 %v1692_v37, %v630_v29  ;;  %v1243_v31 = vpop.f32.mrb[37].mxu1  ;;  %1274 = vmatmul.mubr.msk.bf16.gmra.mrb[36].mxu0 %vm526_vm3, %v656_v28 }
 0x1fa   : > { %v633_v32 = vpop.f32.mrb[38].mxu1  ;;  %1277 = vmatprep.mubr.msk.bf16.mxu0 %vm1485_vm1, %v1483_v1 }
 0x1fb   : > { %v634_v33 = vadd.f32 %v1692_v37, %v633_v32  ;;  %v1244_v34 = vpop.f32.mrb[39].mxu1  ;;  %v649_v36 = vmax.f32 %v631_v30, 0.0 }
 0x1fd   : > { %v650_v35 = vmax.f32 %v634_v33, 0.0 }
 0x1ff   : > { %v657_v38 = vpack.c.bf16 %v650_v35, %v649_v36 }
 0x201   : > { %1278 = vmatmul.mubr.msk.bf16.gmra.mrb[40].mxu0 %vm526_vm3, %v657_v38 }
 0x2a4   : > { %v752_v40 = vpop.f32.mrb[16].mxu0 }
 0x2a5   : > { %v753_v41 = vadd.f32 %v1118_v39, %v752_v40  ;;  %v1255_v42 = vpop.f32.mrb[17].mxu0 }
 0x2a6   : > { %v755_v43 = vpop.f32.mrb[18].mxu0 }
 0x2a7   : > { %807 = vst [vmem:[%s1731_s13] sm:$0xff] %v753_v41  ;;  %v756_v1 = vadd.f32 %v1118_v39, %v755_v43  ;;  %v1256_v37 = vpop.f32.mrb[19].mxu0 }
 0x2a9   : > { %808 = vst [vmem:[%s1731_s13 + $0x8] sm:$0xff] %v756_v1 }
 0x2ac   : > { %v760_v44 = vpop.f32.mrb[20].mxu0 }
 0x2ad   : > { %v761_v45 = vadd.f32 %v1118_v39, %v760_v44  ;;  %v1259_v46 = vpop.f32.mrb[21].mxu0 }
 0x2ae   : > { %v763_v47 = vpop.f32.mrb[22].mxu0 }
 0x2af   : > { %809 = vst [vmem:[%s1731_s13 + $0x10] sm:$0xff] %v761_v45  ;;  %v764_v48 = vadd.f32 %v1118_v39, %v763_v47  ;;  %v1260_v49 = vpop.f32.mrb[23].mxu0 }
 0x2b1   : > { %810 = vst [vmem:[%s1731_s13 + $0x18] sm:$0xff] %v764_v48 }
 0x2b4   : > { %v768_v50 = vpop.f32.mrb[24].mxu0 }
 0x2b5   : > { %v769_v51 = vadd.f32 %v1118_v39, %v768_v50  ;;  %v1263_v52 = vpop.f32.mrb[25].mxu0 }
 0x2b6   : > { %v771_v53 = vpop.f32.mrb[26].mxu0 }
 0x2b7   : > { %811 = vst [vmem:[%s1731_s13 + $0x20] sm:$0xff] %v769_v51  ;;  %v772_v54 = vadd.f32 %v1118_v39, %v771_v53  ;;  %v1264_v55 = vpop.f32.mrb[27].mxu0 }
 0x2b9   : > { %812 = vst [vmem:[%s1731_s13 + $0x28] sm:$0xff] %v772_v54 }
 0x2bc   : > { %v776_v56 = vpop.f32.mrb[28].mxu0 }
 0x2bd   : > { %v777_v57 = vadd.f32 %v1118_v39, %v776_v56  ;;  %v1267_v58 = vpop.f32.mrb[29].mxu0 }
 0x2be   : > { %v779_v59 = vpop.f32.mrb[30].mxu0 }
 0x2bf   : > { %813 = vst [vmem:[%s1731_s13 + $0x30] sm:$0xff] %v777_v57  ;;  %v780_v60 = vadd.f32 %v1118_v39, %v779_v59  ;;  %v1268_v61 = vpop.f32.mrb[31].mxu0 }
 0x2c1   : > { %814 = vst [vmem:[%s1731_s13 + $0x38] sm:$0xff] %v780_v60 }
 0x2c4   : > { %v784_v62 = vpop.f32.mrb[32].mxu0 }
 0x2c5   : > { %v785_v63 = vadd.f32 %v1118_v39, %v784_v62  ;;  %v1271_v0 = vpop.f32.mrb[33].mxu0 }
 0x2c6   : > { %v787_v2 = vpop.f32.mrb[34].mxu0 }
 0x2c7   : > { %815 = vst [vmem:[%s1731_s13 + $0x40] sm:$0xff] %v785_v63  ;;  %v788_v3 = vadd.f32 %v1118_v39, %v787_v2  ;;  %v1272_v4 = vpop.f32.mrb[35].mxu0 }
 0x2c9   : > { %816 = vst [vmem:[%s1731_s13 + $0x48] sm:$0xff] %v788_v3 }
 0x2cc   : > { %v792_v5 = vpop.f32.mrb[36].mxu0 }
 0x2cd   : > { %v793_v6 = vadd.f32 %v1118_v39, %v792_v5  ;;  %v1275_v7 = vpop.f32.mrb[37].mxu0 }
 0x2ce   : > { %v795_v8 = vpop.f32.mrb[38].mxu0 }
 0x2cf   : > { %817 = vst [vmem:[%s1731_s13 + $0x50] sm:$0xff] %v793_v6  ;;  %v796_v9 = vadd.f32 %v1118_v39, %v795_v8  ;;  %v1276_v10 = vpop.f32.mrb[39].mxu0 }
 0x2d1   : > { %818 = vst [vmem:[%s1731_s13 + $0x58] sm:$0xff] %v796_v9 }
 0x2d3   : > { %827 = sbr.rel (!%p1551_p4) target bundleno = 791 (0x317), region = 52 }
 0x2d4   : > { %v800_v11 = vpop.f32.mrb[40].mxu0 }
 0x2d5   : > { %v801_v12 = vadd.f32 %v1118_v39, %v800_v11  ;;  %v1279_v13 = vpop.f32.mrb[41].mxu0 }
 0x2d6   : > { %v803_v14 = vpop.f32.mrb[42].mxu0 }
 0x2d7   : > { %819 = vst [vmem:[%s1731_s13 + $0x60] sm:$0xff] %v801_v12  ;;  %v804_v15 = vadd.f32 %v1118_v39, %v803_v14  ;;  %v1280_v16 = vpop.f32.mrb[43].mxu0 }
 0x2d9   : > { %820 = vst [vmem:[%s1731_s13 + $0x68] sm:$0xff] %v804_v15 }
 0x2da   : > { %s1854_s24 = smov (!%p830_p8, %s829_s24), 14 }
 0x2db   : > { %s1130_s19 = sshll.u32 %s1854_s24, 7 }
 0x2dc   : > { %p1133_p9 = scmp.eq.s32.totalorder %s1130_s19, 0 }
 0x2dd   : > { %1391 = sdivrem.u32 (!%p1133_p9), %s1854_s24, 14 }
 0x2de   : > { %838 = sbr.rel (%p1133_p9) target bundleno = 791 (0x317), region = 56 }
 0x2e6   : > { %s1760_s9 = spop.drf %1391 }
 0x2e7   : > { %p1134_p10 = scmp.le.s32.totalorder %s1760_s9, 0 }
 0x2e8   : > { %s1847_s27 = smov (!%p1134_p10), %s1754_s18  ;;  %s1848_s16 = smov (!%p1134_p10), %s1731_s13 }
 0x2e9   : > { %1046 = sbr.rel (%p1134_p10) target bundleno = 762 (0x2fa), region = 132  ;;  %s1769_s20 = smov (!%p1134_p10), 0  }
 0x2ea   : > { %s1771_s21 = smov (!%p1134_p10), 0  }
 0x2f0 LB: >> { %v928_v17 = vld [vmem:[%s1457_s16] sm:$0xff]  ;;  %v930_v18 = vld [vmem:[%s1457_s16 + $0x8] sm:$0xff]  ;;  %v932_v19 = vld [vmem:[%s1457_s16 + $0x10] sm:$0xff]  ;;  %s956_s22 = sadd.s32 1, %s1461_s20  ;;  %s922_s21 = sadd.s32 1, %s1465_s21   ;;  %s1465_s21 = sphi %s1771_s21, %s922_s21   ;;  %s1461_s20 = sphi %s1769_s20, %s1849_s20   ;;  %s1457_s16 = sphi %s1848_s16, %s961_s16   ;;  %s1453_s27 = sphi %s1847_s27, %s962_s27  }
 0x2f1   : >> { %929 = vst [vmem:[%s1453_s27] sm:$0xff] %v928_v17  ;;  %931 = vst [vmem:[%s1453_s27 + $0x8] sm:$0xff] %v930_v18  ;;  %v934_v20 = vld [vmem:[%s1457_s16 + $0x18] sm:$0xff]  ;;  %v936_v21 = vld [vmem:[%s1457_s16 + $0x20] sm:$0xff]  ;;  %p957_p11 = scmp.ge.s32.totalorder %s956_s22, %s1760_s9  ;;  %p921_p12 = scmp.ge.s32.totalorder %s922_s21, %s1760_s9 }
 0x2f2   : >> { %933 = vst [vmem:[%s1453_s27 + $0x10] sm:$0xff] %v932_v19  ;;  %v938_v22 = vld [vmem:[%s1457_s16 + $0x28] sm:$0xff]  ;;  %935 = vst [vmem:[%s1453_s27 + $0x18] sm:$0xff] %v934_v20  ;;  %v940_v23 = vld [vmem:[%s1457_s16 + $0x30] sm:$0xff] }
 0x2f3   : >> { %937 = vst [vmem:[%s1453_s27 + $0x20] sm:$0xff] %v936_v21  ;;  %939 = vst [vmem:[%s1453_s27 + $0x28] sm:$0xff] %v938_v22  ;;  %v942_v24 = vld [vmem:[%s1457_s16 + $0x38] sm:$0xff]  ;;  %v944_v25 = vld [vmem:[%s1457_s16 + $0x40] sm:$0xff]  ;;  %s1856_s22 = smov (%p957_p11, %s956_s22), 0  ;;  %924 = sbr.rel (!%p921_p12) target bundleno = 752 (0x2f0), region = 138 }
 0x2f4   : >> { %941 = vst [vmem:[%s1453_s27 + $0x30] sm:$0xff] %v940_v23  ;;  %943 = vst [vmem:[%s1453_s27 + $0x38] sm:$0xff] %v942_v24  ;;  %v946_v26 = vld [vmem:[%s1457_s16 + $0x48] sm:$0xff]  ;;  %v948_v27 = vld [vmem:[%s1457_s16 + $0x50] sm:$0xff]  ;;  %s959_s23 = smul.u32 112, %s1856_s22  ;;  %s1849_s20 = smov %s1856_s22 }
 0x2f5   : >> { %945 = vst [vmem:[%s1453_s27 + $0x40] sm:$0xff] %v944_v25  ;;  %v950_v28 = vld [vmem:[%s1457_s16 + $0x58] sm:$0xff]  ;;  %947 = vst [vmem:[%s1453_s27 + $0x48] sm:$0xff] %v946_v26  ;;  %v952_v29 = vld [vmem:[%s1457_s16 + $0x60] sm:$0xff] }
 0x2f6   : >> { %949 = vst [vmem:[%s1453_s27 + $0x50] sm:$0xff] %v948_v27  ;;  %951 = vst [vmem:[%s1453_s27 + $0x58] sm:$0xff] %v950_v28  ;;  %v954_v30 = vld [vmem:[%s1457_s16 + $0x68] sm:$0xff]  ;;  %s961_s16 = scalar_lea.vmem %s1731_s13, %s959_s23 [#allocation2]  }
 0x2f7   : >> { %953 = vst [vmem:[%s1453_s27 + $0x60] sm:$0xff] %v952_v29  ;;  %955 = vst [vmem:[%s1453_s27 + $0x68] sm:$0xff] %v954_v30  ;;  %s962_s27 = scalar_lea.vmem %s1754_s18, %s959_s23  }
 0x2fa PF: > { %1393 = sdivrem.u32 %s1854_s24, 14 }
 0x2fb   : > { %s1135_s26 = smul.u32 112, %s1760_s9 }
 0x2fd   : > { %s967_s29 = scalar_lea.vmem %s1731_s13, %s1135_s26 [#allocation2]   ;;  %s969_s30 = scalar_lea.vmem %s1754_s18, %s1135_s26  }
 0x303   : > { %s1394_s10 = spop.drf %1393 }
 0x304   : > { %p1137_p13 = scmp.le.s32.totalorder %s1394_s10, 0 }
 0x305   : > { %s1467_s11 = smov (!%p1137_p13), %s969_s30   ;;  %s1471_s12 = smov (!%p1137_p13), %s967_s29  }
 0x306   : > { %1060 = sbr.rel (%p1137_p13) target bundleno = 791 (0x317), region = 143  ;;  %s1475_s14 = smov (!%p1137_p13), 0  }
 0x307   : > { %s1479_s15 = smov (!%p1137_p13), 0  }
 0x30d LB: >> { %v979_v31 = vld [vmem:[%s1473_s12] sm:$0xff]  ;;  %s981_s17 = sadd.s32 1, %s1477_s14  ;;  %s973_s15 = sadd.s32 1, %s1481_s15   ;;  %s1481_s15 = sphi %s1479_s15, %s973_s15   ;;  %s1477_s14 = sphi %s1475_s14, %s1476_s14   ;;  %s1473_s12 = sphi %s1471_s12, %s986_s12   ;;  %s1469_s11 = sphi %s1467_s11, %s987_s11  }
 0x30e   : >> { %980 = vst [vmem:[%s1469_s11] sm:$0xff] %v979_v31  ;;  %p982_p0 = scmp.ge.s32.totalorder %s981_s17, %s1394_s10  ;;  %p972_p1 = scmp.ge.s32.totalorder %s973_s15, %s1394_s10 }
 0x310   : >> { %s1858_s17 = smov (%p982_p0, %s981_s17), 0  ;;  %975 = sbr.rel (!%p972_p1) target bundleno = 781 (0x30d), region = 149 }
 0x311   : >> { %s1138_s13 = sshll.u32 %s1858_s17, 3  ;;  %s1476_s14 = smov %s1858_s17  }
 0x312   : >> { %s986_s12 = scalar_lea.vmem %s967_s29, %s1138_s13 [#allocation2]   ;;  %s987_s11 = scalar_lea.vmem %s969_s30, %s1138_s13  }
 0x317 PF: > { %p14_p2 = scmp.ge.s32.totalorder %s1541_s28, 4   ;;  %s1850_s24 = smov %s1445_s25 }
 0x318   : > { %s1851_s25 = smov %s1549_s8  ;;  %s1852_s26 = smov %s1541_s28 }
 0x319   :  { %16 = sbr.rel (!%p14_p2) target bundleno = 2 (0x2), region = 160 }

</bundles_post_ra>
